<compile_context>
chip_gen: v7x
topology: tpu7x:2x2x1
jax: 0.10.0
libtpu: 0.0.40
codegen_flags: <defaults>
</compile_context>

<pallas_src>
import functools

import jax
import jax.numpy as jnp
import numpy as np
from jax import lax
from jax.experimental import pallas as pl
from jax.experimental.pallas import tpu as pltpu

_LANES = 128
_MAX_TILE_ROWS = 8192      # rows per grid chunk: 8192*128*4 B = 4 MiB f32 per input block
_SUB_ROWS = 512            # inner fori_loop sub-chunk: bounds live temporaries (~2 MiB)
_TARGET_BLOCK_ROWS = 8192  # sample-batching target: tn * tile_rows ~= this many rows
# Pad value for ragged C*H*W.  Must stay FINITE: sigmoid(-1e9) == 0 and the BCE term is
# exactly 0 for (x=-1e9, t=0), while -inf would give (-inf)*0 = NaN in the x*t term.
_PRED_PAD = -1e9


def _cdiv(a, b):
    return -(-a // b)


def _round_up(x, m):
    return ((x + m - 1) // m) * m


def _plan(n, chw):
    """Pick (rows, tn, num_sample_blocks, num_chunks, tile_rows, sub_rows, n_sub, mask)."""
    rows = _cdiv(chw, _LANES)                      # 128-lane rows per sample
    num_chunks = _cdiv(rows, _MAX_TILE_ROWS)       # row chunks per sample
    if n == 1 and num_chunks == 1 and rows >= 16:
        num_chunks = 2                             # keep both v7x TensorCores busy
    rpc = _cdiv(rows, num_chunks)                  # rows per chunk (pre-rounding)
    n_sub = max(1, _cdiv(rpc, _SUB_ROWS))          # inner sub-chunks per grid block
    sub_rows = _round_up(_cdiv(rpc, n_sub), 8)     # sub-chunk rows (sublane multiple)
    tile_rows = sub_rows * n_sub                   # rows per grid block (>= rpc)
    tn = max(1, _TARGET_BLOCK_ROWS // tile_rows)   # samples per grid block
    if n >= 2:
        tn = min(tn, (n + 1) // 2)                 # >= 2 sample blocks => megacore
    tn = min(tn, n)
    num_sample_blocks = _cdiv(n, tn)
    need_row_mask = num_chunks * tile_rows != rows
    return rows, tn, num_sample_blocks, num_chunks, tile_rows, sub_rows, n_sub, need_row_mask


def _partials_kernel(pred_ref, targ_ref, out_ref, *,
                     sub_rows, n_sub, rows_valid, need_row_mask):
    """Per (sample-block, row-chunk) grid step, write (tn, 1, 24, 128) partials:
       rows 0:8 = sum(sigmoid(x)*t), 8:16 = sum(sigmoid(x)+t), 16:24 = sum(bce)."""
    tn = pred_ref.shape[0]
    tile_rows = pred_ref.shape[1]
    row0 = pl.program_id(1) * tile_rows            # global row offset of this chunk

    def sample_body(nb, carry):
        def chunk_body(c, acc):
            num_acc, den_acc, bce_acc = acc
            r = pl.multiple_of(c * sub_rows, 8)
            x = pred_ref[nb, pl.ds(r, sub_rows), :].astype(jnp.float32)
            t = targ_ref[nb, pl.ds(r, sub_rows), :].astype(jnp.float32)
            if need_row_mask:
                gid = row0 + r + lax.broadcasted_iota(jnp.int32, (sub_rows, _LANES), 0)
                valid = gid < rows_valid
                x = jnp.where(valid, x, _PRED_PAD)   # finite pad => exactly 0 contribution
                t = jnp.where(valid, t, 0.0)
            # One exp per element shared by sigmoid and the stable BCE log term.
            e = jnp.exp(-jnp.abs(x))
            one_pe = 1.0 + e
            inv = pl.reciprocal(one_pe, approx=True)     # EUP slot, not VALU
            inv = inv * (2.0 - one_pe * inv)             # one Newton step (~1e-7 rel err)
            sig = jnp.where(x >= 0.0, inv, e * inv)      # == sigmoid(x)
            # PyTorch-style stable BCEWithLogits: max(x,0) - x*t + log1p(exp(-|x|))
            bce = jnp.maximum(x, 0.0) - x * t + jnp.log1p(e)

            def fold(v):   # (sub_rows,128) -> (8,128); pure VPU vreg adds (no XLU)
                return v.reshape(sub_rows // 8, 8, _LANES).sum(axis=0)

            return (num_acc + fold(sig * t),
                    den_acc + fold(sig + t),
                    bce_acc + fold(bce))

        zero = jnp.zeros((8, _LANES), jnp.float32)
        num_acc, den_acc, bce_acc = lax.fori_loop(0, n_sub, chunk_body, (zero, zero, zero))
        out_ref[nb, 0, 0:8, :] = num_acc
        out_ref[nb, 0, 8:16, :] = den_acc
        out_ref[nb, 0, 16:24, :] = bce_acc
        return carry

    lax.fori_loop(0, tn, sample_body, 0)


def combined_loss(pred, target, alpha=0.5, *, smooth=1e-8):
    """pred, target: (N, C, H, W); pred = logits.  Returns scalar f32 loss.

    Inputs are consumed in their native dtypes (upcast to f32 per block in-kernel), so
    bf16 logits / int8 masks stream at reduced HBM cost without any wrapper-side cast."""
    n, c, h, w = pred.shape
    chw = c * h * w
    (rows, tn, ns, num_chunks, tile_rows, sub_rows, n_sub,
     need_row_mask) = _plan(n, chw)

    p = pred.reshape(n, chw)
    t = target.reshape(n, chw)
    lane_pad = rows * _LANES - chw
    if lane_pad:
        # Only a ragged C*H*W (not a multiple of 128) pays this copy; the aligned case is
        # a free reshape.  The -1e9 / 0 pad contributes exactly 0 to every reduction.
        # TODO(synk): lane-mask the tail in-kernel on a 2-D (N, chw) view to avoid this
        # copy for ragged shapes as well.
        p = jnp.pad(p, ((0, 0), (0, lane_pad)), constant_values=_PRED_PAD)
        t = jnp.pad(t, ((0, 0), (0, lane_pad)), constant_values=0)
    p = p.reshape(n, rows, _LANES)
    t = t.reshape(n, rows, _LANES)

    kernel = functools.partial(_partials_kernel, sub_rows=sub_rows, n_sub=n_sub,
                               rows_valid=rows, need_row_mask=need_row_mask)

    parts = pl.pallas_call(
        kernel,
        out_shape=jax.ShapeDtypeStruct((ns * tn, num_chunks, 24, _LANES), jnp.float32),
        grid=(ns, num_chunks),
        in_specs=[
            pl.BlockSpec((tn, tile_rows, _LANES), lambda i, j: (i, j, 0)),
            pl.BlockSpec((tn, tile_rows, _LANES), lambda i, j: (i, j, 0)),
        ],
        out_specs=pl.BlockSpec((tn, 1, 24, _LANES), lambda i, j: (i, j, 0, 0)),
        compiler_params=pltpu.CompilerParams(
            dimension_semantics=("parallel", "parallel"),
            vmem_limit_bytes=40 << 20),   # budgeted for v7x's 64 MiB physical VMEM
    )(p, t)

    # Tiny epilogue in plain JAX: collapse the lane/sublane partials, combine the losses.
    sums = parts.reshape(ns * tn, num_chunks, 3, 8, _LANES).sum(axis=(1, 3, 4))[:n]
    dice_num = 2.0 * sums[:, 0]
    dice_den = sums[:, 1]
    dice = jnp.mean(1.0 - (dice_num + smooth) / (dice_den + smooth))
    bce = jnp.sum(sums[:, 2]) / float(n * chw)
    return alpha * dice + (1.0 - alpha) * bce


def _reference_combined_loss(pred, target, alpha=0.5, smooth=1e-8):
    """Pure-JAX reference mirroring the PyTorch module."""
    x = pred.astype(jnp.float32)
    t = target.astype(jnp.float32)
    sig = jax.nn.sigmoid(x)
    num = 2.0 * jnp.sum(sig * t, axis=(1, 2, 3))
    den = jnp.sum(sig + t, axis=(1, 2, 3))
    dice = jnp.mean(1.0 - (num + smooth) / (den + smooth))
    bce = jnp.mean(jnp.maximum(x, 0.0) - x * t + jnp.log1p(jnp.exp(-jnp.abs(x))))
    return alpha * dice + (1.0 - alpha) * bce


if __name__ == "__main__":
    key = jax.random.PRNGKey(0)
    k_pred, k_targ = jax.random.split(key)

    N, C, H, W = 2, 4, 16, 16
    pred = jax.random.normal(k_pred, (N, C, H, W), dtype=jnp.float32)
    target = (jax.random.uniform(k_targ, (N, C, H, W)) > 0.5).astype(jnp.float32)

    loss = jax.block_until_ready(combined_loss(pred, target, alpha=0.5))
    ref = jax.block_until_ready(_reference_combined_loss(pred, target, alpha=0.5))
    np.testing.assert_allclose(np.asarray(loss), np.asarray(ref), rtol=1e-5, atol=1e-5)

    print("KERNEL_OK")
</pallas_src>

<mosaic_0001>
module attributes {stable_mosaic.version = 11 : i64} {
  func.func @_partials_kernel(%arg0: i32, %arg1: i32, %arg2: memref<1x8x128xf32, #tpu.memory_space<vmem>>, %arg3: memref<1x8x128xf32, #tpu.memory_space<vmem>>, %arg4: memref<1x1x24x128xf32, #tpu.memory_space<vmem>>) attributes {dimension_semantics = [#tpu.dimension_semantics<parallel>, #tpu.dimension_semantics<parallel>], iteration_bounds = array<i64: 2, 1>, scalar_prefetch = 0 : i64, scratch_operands = 0 : i64, tpu.core_type = #tpu.core_type<tc>, window_params = [{transform_indices = @transform_0, window_bounds = array<i64: 1, 8, 128>}, {transform_indices = @transform_1, window_bounds = array<i64: 1, 8, 128>}, {transform_indices = @transform_2, window_bounds = array<i64: 1, 1, 24, 128>}]} {
    %c0_i32 = arith.constant 0 : i32
    %cst = arith.constant 0.000000e+00 : f32
    %0 = vector.broadcast %cst : f32 to vector<8x128xf32>
    %c0_i32_0 = arith.constant 0 : i32
    %c8_i32 = arith.constant 8 : i32
    %1 = arith.muli %c0_i32_0, %c8_i32 : i32
    %2 = tpu.assume_multiple %1, 8 : i32
    %3 = arith.index_cast %c0_i32 : i32 to index
    %4 = arith.index_cast %2 : i32 to index
    %c0 = arith.constant 0 : index
    %5 = vector.load %arg2[%3, %4, %c0] : memref<1x8x128xf32, #tpu.memory_space<vmem>>, vector<1x8x128xf32>
    %6 = vector.shape_cast %5 : vector<1x8x128xf32> to vector<8x128xf32>
    %7 = arith.index_cast %c0_i32 : i32 to index
    %8 = arith.index_cast %2 : i32 to index
    %c0_1 = arith.constant 0 : index
    %9 = vector.load %arg3[%7, %8, %c0_1] : memref<1x8x128xf32, #tpu.memory_space<vmem>>, vector<1x8x128xf32>
    %10 = vector.shape_cast %9 : vector<1x8x128xf32> to vector<8x128xf32>
    %11 = math.absf %6 : vector<8x128xf32>
    %cst_2 = arith.constant 0.000000e+00 : f32
    %12 = vector.broadcast %cst_2 : f32 to vector<8x128xf32>
    %13 = arith.subf %12, %11 : vector<8x128xf32>
    %14 = math.exp %13 : vector<8x128xf32>
    %cst_3 = arith.constant 1.000000e+00 : f32
    %15 = vector.broadcast %cst_3 : f32 to vector<8x128xf32>
    %16 = arith.addf %15, %14 : vector<8x128xf32>
    %17 = tpu.reciprocal %16 {approx = true} : vector<8x128xf32> -> vector<8x128xf32>
    %18 = arith.mulf %16, %17 : vector<8x128xf32>
    %cst_4 = arith.constant 2.000000e+00 : f32
    %19 = vector.broadcast %cst_4 : f32 to vector<8x128xf32>
    %20 = arith.subf %19, %18 : vector<8x128xf32>
    %21 = arith.mulf %17, %20 : vector<8x128xf32>
    %cst_5 = arith.constant 0.000000e+00 : f32
    %22 = vector.broadcast %cst_5 : f32 to vector<8x128xf32>
    %23 = arith.cmpf oge, %6, %22 : vector<8x128xf32>
    %24 = arith.mulf %14, %21 : vector<8x128xf32>
    %25 = arith.select %23, %21, %24 : vector<8x128xi1>, vector<8x128xf32>
    %cst_6 = arith.constant 0.000000e+00 : f32
    %26 = vector.broadcast %cst_6 : f32 to vector<8x128xf32>
    %27 = arith.maximumf %6, %26 : vector<8x128xf32>
    %28 = arith.mulf %6, %10 : vector<8x128xf32>
    %29 = arith.subf %27, %28 : vector<8x128xf32>
    %30 = math.log1p %14 : vector<8x128xf32>
    %31 = arith.addf %29, %30 : vector<8x128xf32>
    %32 = arith.mulf %25, %10 : vector<8x128xf32>
    %33 = vector.shape_cast %32 : vector<8x128xf32> to vector<1x8x128xf32>
    %cst_7 = arith.constant dense<0.000000e+00> : vector<8x128xf32>
    %34 = vector.multi_reduction <add>, %33, %cst_7 [0] : vector<1x8x128xf32> to vector<8x128xf32>
    %35 = arith.addf %0, %34 : vector<8x128xf32>
    %36 = arith.addf %25, %10 : vector<8x128xf32>
    %37 = vector.shape_cast %36 : vector<8x128xf32> to vector<1x8x128xf32>
    %cst_8 = arith.constant dense<0.000000e+00> : vector<8x128xf32>
    %38 = vector.multi_reduction <add>, %37, %cst_8 [0] : vector<1x8x128xf32> to vector<8x128xf32>
    %39 = arith.addf %0, %38 : vector<8x128xf32>
    %40 = vector.shape_cast %31 : vector<8x128xf32> to vector<1x8x128xf32>
    %cst_9 = arith.constant dense<0.000000e+00> : vector<8x128xf32>
    %41 = vector.multi_reduction <add>, %40, %cst_9 [0] : vector<1x8x128xf32> to vector<8x128xf32>
    %42 = arith.addf %0, %41 : vector<8x128xf32>
    %c1_i32 = arith.constant 1 : i32
    %43 = arith.index_cast %c0_i32 : i32 to index
    %c0_10 = arith.constant 0 : index
    %c0_11 = arith.constant 0 : index
    %c0_12 = arith.constant 0 : index
    %44 = vector.load %arg4[%43, %c0_10, %c0_11, %c0_12] : memref<1x1x24x128xf32, #tpu.memory_space<vmem>>, vector<1x1x8x128xf32>
    %45 = vector.shape_cast %44 : vector<1x1x8x128xf32> to vector<8x128xf32>
    %46 = vector.shape_cast %35 : vector<8x128xf32> to vector<1x1x8x128xf32>
    tpu.vector_store %arg4[%43, %c0_10, %c0_11, %c0_12], %46 {strides = array<i32>} : memref<1x1x24x128xf32, #tpu.memory_space<vmem>>, vector<1x1x8x128xf32>,
    %47 = arith.index_cast %c0_i32 : i32 to index
    %c0_13 = arith.constant 0 : index
    %c8 = arith.constant 8 : index
    %c0_14 = arith.constant 0 : index
    %48 = vector.load %arg4[%47, %c0_13, %c8, %c0_14] : memref<1x1x24x128xf32, #tpu.memory_space<vmem>>, vector<1x1x8x128xf32>
    %49 = vector.shape_cast %48 : vector<1x1x8x128xf32> to vector<8x128xf32>
    %50 = vector.shape_cast %39 : vector<8x128xf32> to vector<1x1x8x128xf32>
    tpu.vector_store %arg4[%47, %c0_13, %c8, %c0_14], %50 {strides = array<i32>} : memref<1x1x24x128xf32, #tpu.memory_space<vmem>>, vector<1x1x8x128xf32>,
    %51 = arith.index_cast %c0_i32 : i32 to index
    %c0_15 = arith.constant 0 : index
    %c16 = arith.constant 16 : index
    %c0_16 = arith.constant 0 : index
    %52 = vector.load %arg4[%51, %c0_15, %c16, %c0_16] : memref<1x1x24x128xf32, #tpu.memory_space<vmem>>, vector<1x1x8x128xf32>
    %53 = vector.shape_cast %52 : vector<1x1x8x128xf32> to vector<8x128xf32>
    %54 = vector.shape_cast %42 : vector<8x128xf32> to vector<1x1x8x128xf32>
    tpu.vector_store %arg4[%51, %c0_15, %c16, %c0_16], %54 {strides = array<i32>} : memref<1x1x24x128xf32, #tpu.memory_space<vmem>>, vector<1x1x8x128xf32>,
    %c1_i32_17 = arith.constant 1 : i32
    return
  }
  func.func @transform_0(%arg0: i32, %arg1: i32) -> (i32, i32, i32) {
    %c0_i32 = arith.constant 0 : i32
    %c0_i32_0 = arith.constant 0 : i32
    return %arg0, %arg1, %c0_i32 : i32, i32, i32
  }
  func.func @transform_1(%arg0: i32, %arg1: i32) -> (i32, i32, i32) {
    %c0_i32 = arith.constant 0 : i32
    %c0_i32_0 = arith.constant 0 : i32
    return %arg0, %arg1, %c0_i32 : i32, i32, i32
  }
  func.func @transform_2(%arg0: i32, %arg1: i32) -> (i32, i32, i32, i32) {
    %c0_i32 = arith.constant 0 : i32
    %c0_i32_0 = arith.constant 0 : i32
    %c0_i32_1 = arith.constant 0 : i32
    return %arg0, %arg1, %c0_i32, %c0_i32_0 : i32, i32, i32, i32
  }
}

</mosaic_0001>

<bundles_post_ra>
// kernel: tpu_custom_call.1
= control target key start
LH: loop header
LB: loop body
LE: loop exit
PB: predicated region body
PF: predicated region fallthrough
CT: control target
= control target key end

     0   :  { %7 = vsyncpa [#allocation3], 0  ;;  %s861_s0 = inlined_call_operand.hbm [shape: f32[2,8,128], index: 0, kind: input, shape index: {}]   ;;  %s862_s1 = inlined_call_operand.hbm [shape: f32[2,8,128], index: 1, kind: input, shape index: {}]   ;;  %s863_s2 = inlined_call_operand.hbm [shape: f32[2,1,24,128], index: 2, kind: output, shape index: {}]  }
   0x1   :  { %9 = vsyncpa [#allocation3 + $0x1], 0 }
   0x2   :  { %10 = vsyncpa [#allocation6], 0 }
   0x3   :  { %12 = vsyncpa [#allocation6 + $0x1], 0 }
   0x4   :  { %13 = vsyncpa [#allocation4], 0 }
   0x5   :  { %15 = vsyncpa [#allocation4 + $0x1], 0  ;;  %s638_s9 = smov 0   ;;  %s640_s10 = smov 0  }
   0x6   :  { %s642_s11 = smov 0   ;;  %s644_s12 = smov 0  }
   0x7   :  { %s646_s13 = smov 0   ;;  %s648_s14 = smov 0  }
   0x8 LB: > { %s379_s15 = sadd.s32 4294967295, %s616_s14   ;;  %s380_s16 = sadd.s32 4294967294, %s616_s14   ;;  %s616_s14 = sphi %s648_s14, %s21_s14   ;;  %s612_s13 = sphi %s646_s13, %s883_s13   ;;  %s608_s12 = sphi %s644_s12, %s882_s12   ;;  %s604_s11 = sphi %s642_s11, %s881_s11   ;;  %s600_s10 = sphi %s640_s10, %s880_s10   ;;  %s596_s9 = sphi %s638_s9, %s879_s9  }
   0x9   : > { %s33_s17 = sadd.s32 1, %s612_s13  ;;  %s42_s18 = sadd.s32 1, %s604_s11 }
   0xa   : > { %p35_p0 = scmp.ge.s32.totalorder %s33_s17, 2  ;;  %p49_p1 = scmp.ne.s32.totalorder %s604_s11, %s600_s10 }
   0xb   : > { %p50_p2 = scmp.eq.s32.totalorder %s616_s14, 0  ;;  %p55_p3 = scmp.ne.s32.totalorder %s600_s10, %s596_s9 }
   0xc   : > { %s885_s17 = smov (%p35_p0, %s33_s17), 0  ;;  %p56_p5 = scmp.eq.s32.totalorder %s379_s15, 0 }
   0xd   : > { %p679_p4 = por %p50_p2, %p49_p1  ;;  %s37_s20 = ssub.s32 %s612_s13, %s885_s17 }
   0xe   : > { %p109_p6 = scmp.eq.s32.totalorder %s379_s15, 1  ;;  %p40_p7 = scmp.eq.s32.totalorder %s37_s20, 0 }
   0xf   : > { %p685_p8 = por %p56_p5, %p55_p3  ;;  %p115_p10 = scmp.eq.s32.totalorder %s380_s16, 1 }
  0x10   : > { %p689_p9 = por %p109_p6, %p49_p1  ;;  %p412_p13 = scmp.lt.s32.totalorder %s616_s14, 2 }
  0x11   : > { %s867_s21 = scalar_select %p685_p8, 1, 0 }
  0x12   : > { %s868_s22 = scalar_select %p689_p9, 1, 0 }
  0x13   : > { %s694_s23 = scalar_select %p40_p7, %s604_s11, %s42_s18  }
  0x14   : > { %p696_p11 = por %p115_p10, %p55_p3  ;;  %s703_s25 = sand.u32 1, %s604_s11  }
  0x15   : > { %s383_s26 = sshll.u32 %s703_s25, 3  ;;  %s384_s27 = sshll.u32 %s612_s13, 7 }
  0x16   : > { %s869_s24 = scalar_select %p696_p11, 1, 0 }
  0x17   : > { %s712_s30 = scalar_lea.hbm %s861_s0, %s384_s27  ;;  %s139_s3 = scalar_lea.vmem [#allocation2], %s383_s26 }
  0x18   : > { %s147_s4 = sshll.u32 %s139_s3, 4  ;;  %p720_p0 = pnand %p412_p13, %p679_p4  ;;  %s716_s4 = int_to_ptr.vmem [resolvable:$true] %s147_s4 }
  0x19   : > { %s136_s6 = scalar_lea.sflag [#allocation3], %s703_s25  ;;  %s470_s7 = scalar_lea.hbm %s712_s30, 128 }
  0x1a   : > { %p471_p3 = scmp.ne.s32.totalorder %s712_s30, %s470_s7  ;;  %p472_p5 = pneg %p720_p0 }
  0x1b   : > { %s475_s16 = scalar_lea.hbm %s861_s0, 256  ;;  %p476_p4 = scmp.lt.u32.totalorder %s712_s30, %s861_s0 }
  0x1c   : > { %p473_p6 = pnand %p472_p5, %p471_p3  ;;  %p477_p10 = scmp.lt.u32.totalorder %s475_s16, %s470_s7 }
  0x1d   : > { %p479_p12 = scmp.lt.u32.totalorder %s470_s7, %s712_s30 }
  0x1e   : > { %p474_p7 = pneg %p473_p6  ;;  %p478_p13 = por %p477_p10, %p476_p4 }
  0x20   : > { %p480_p1 = por %p479_p12, %p478_p13 }
  0x22   : > { %p481_p2 = pnand %p480_p1, %p474_p7 }
  0x24   : > { %484 = shalt.err (!%p481_p2)
}
  0x25   : > { %s485_s20 = scalar_lea.vmem %s716_s4, 128  ;;  %s618_s28 = smov [#allocation2]  }
  0x26   : > { %p486_p3 = scmp.ne.s32.totalorder %s716_s4, %s485_s20  ;;  %s490_s29 = sshll.u32 %s618_s28, 4  ;;  %s491_s29 = int_to_ptr.vmem [resolvable:$false] %s490_s29 }
  0x27   : > { %s492_s3 = scalar_lea.vmem %s491_s29, 256  ;;  %p493_p9 = scmp.lt.s32.totalorder %s716_s4, %s491_s29 }
  0x28   : > { %p488_p6 = pnand %p486_p3, %p472_p5  ;;  %p494_p4 = scmp.lt.s32.totalorder %s492_s3, %s485_s20 }
  0x2a   : > { %p489_p11 = pneg %p488_p6  ;;  %p495_p10 = por %p494_p4, %p493_p9 }
  0x2c   : > { %p496_p12 = pnand %p495_p10, %p489_p11 }
  0x2e   : > { %499 = shalt.err (!%p496_p12)
}
  0x2f   : > { %404 = dma.hbm_to_vmem [thread:$0]  (!%p720_p0), %s712_s30, 128, %s716_s4, %s136_s6  }
  0x30   : > { %p871_p1 = scmp.lt.s32.totalorder %s616_s14, 3  ;;  %p872_p2 = scmp.ge.s32.totalorder %s616_s14, 1 }
  0x31   : > { %s765_s16 = scalar_lea.hbm %s862_s1, %s384_s27  ;;  %s158_s18 = scalar_lea.vmem [#allocation5], %s383_s26 }
  0x32   : > { %p756_p7 = pnand %p872_p2, %p871_p1  ;;  %s166_s19 = sshll.u32 %s158_s18, 4  ;;  %s167_s19 = int_to_ptr.vmem [resolvable:$true] %s166_s19 }
  0x33   : > { %s155_s30 = scalar_lea.sflag [#allocation6], %s703_s25  ;;  %s500_s4 = scalar_lea.hbm %s765_s16, 128 }
  0x34   : > { %s873_s7 = scalar_select %p756_p7, 1, 0 }
  0x35   : > { %p501_p9 = scmp.ne.s32.totalorder %s765_s16, %s500_s4  ;;  %s505_s27 = scalar_lea.hbm %s862_s1, 256 }
  0x36   : > { %p506_p3 = scmp.lt.u32.totalorder %s765_s16, %s862_s1  ;;  %p507_p6 = scmp.lt.u32.totalorder %s505_s27, %s500_s4 }
  0x37   : > { %p503_p11 = pnand %p501_p9, %p472_p5  ;;  %p509_p10 = scmp.lt.u32.totalorder %s500_s4, %s765_s16 }
  0x38   : > { %p508_p4 = por %p507_p6, %p506_p3 }
  0x39   : > { %p504_p13 = pneg %p503_p11 }
  0x3a   : > { %p510_p12 = por %p509_p10, %p508_p4 }
  0x3c   : > { %p511_p1 = pnand %p510_p12, %p504_p13 }
  0x3e   : > { %514 = shalt.err (!%p511_p1)
}
  0x3f   : > { %s515_s25 = scalar_lea.vmem %s167_s19, 128  ;;  %s619_s26 = smov [#allocation5]  }
  0x40   : > { %p516_p2 = scmp.ne.s32.totalorder %s167_s19, %s515_s25  ;;  %s520_s3 = sshll.u32 %s619_s26, 4  ;;  %s521_s3 = int_to_ptr.vmem [resolvable:$false] %s520_s3 }
  0x41   : > { %s522_s8 = scalar_lea.vmem %s521_s3, 256  ;;  %p523_p8 = scmp.lt.s32.totalorder %s167_s19, %s521_s3 }
  0x42   : > { %p518_p9 = pnand %p516_p2, %p472_p5  ;;  %p524_p7 = scmp.lt.s32.totalorder %s522_s8, %s515_s25 }
  0x44   : > { %p519_p11 = pneg %p518_p9  ;;  %p525_p3 = por %p524_p7, %p523_p8 }
  0x46   : > { %p526_p6 = pnand %p525_p3, %p519_p11 }
  0x48   : > { %529 = shalt.err (!%p526_p6)
}
  0x49   : > { %407 = dma.hbm_to_vmem [thread:$0]  (!%p720_p0), %s765_s16, 128, %s167_s19, %s155_s30  }
  0x4a   : > { %p874_p13 = scmp.ne.s32.totalorder %s873_s7, 0 }
  0x4b   : > { %s792_s15 = sand.u32 (!%p874_p13), 1, %s600_s10   ;;  %p875_p5 = scmp.ne.s32.totalorder (!%p874_p13), %s867_s21, 0 }
  0x4c   : > { %175 = sbr.rel (%p874_p13) target bundleno = 143 (0x8f), region = 28  ;;  %s388_s18 = sshll.u32 (!%p874_p13), %s792_s15, 3 }
  0x4d   : > { %s178_s4 = scalar_lea.sflag (!%p874_p13), [#allocation3], %s792_s15  ;;  %s181_s6 = scalar_lea.vmem (!%p874_p13), [#allocation2], %s388_s18 }
  0x53   : > { %583 = dma.done.wait (%p875_p5), %s178_s4, 128  }
  0x54   : > { %585 = vsyncadd (%p875_p5), %s178_s4, 4294967168  ;;  %s187_s5 = scalar_lea.sflag [#allocation6], %s792_s15  ;;  %s190_s16 = scalar_lea.vmem [#allocation5], %s388_s18 }
  0x55   : > { %587 = dma.done.wait (%p875_p5), %s187_s5, 128  }
  0x56   : > { %589 = vsyncadd (%p875_p5), %s187_s5, 4294967168  ;;  %v216_v0 = vld [vmem:[%s181_s6] sm:$0xff]  ;;  %v217_v7 = vld [vmem:[%s190_s16] sm:$0xff]  ;;  %s393_s21 = smul.u32 24, %s792_s15  ;;  %p876_p0 = scmp.ne.s32.totalorder %s868_s22, 0 }
  0x57   : > { %v218_v1 = vand.u32 2147483647, %v216_v0  ;;  %v230_v9 = vmax.f32 %v216_v0, 0.0  ;;  %v231_v10 = vmul.f32 %v217_v7, %v216_v0  ;;  %vm227_vm1 = vcmp.ge.f32.partialorder %v216_v0, 0.0  ;;  %s394_s7 = smul.u32 384, %s608_s12  ;;  %s255_s12 = scalar_lea.sflag [#allocation4], %s792_s15 }
  0x58   : > { %s215_s19 = scalar_lea.vmem [#allocation7], %s393_s21  ;;  %s620_s25 = smov [#allocation7]  }
  0x59   : > { %v219_v2 = vsub.f32 0.0, %v218_v1  ;;  %v232_v16 = vsub.f32 %v230_v9, %v231_v10  ;;  %s270_s30 = sshll.u32 %s215_s19, 4  ;;  %s812_s28 = scalar_lea.hbm %s863_s2, %s394_s7  ;;  %s807_s30 = int_to_ptr.vmem [resolvable:$true] %s270_s30 }
  0x5a   : > { %s530_s29 = scalar_lea.vmem %s807_s30, 384  ;;  %s534_s26 = sshll.u32 %s620_s25, 4  ;;  %s535_s26 = int_to_ptr.vmem [resolvable:$false] %s534_s26 }
  0x5b   : > { %v220_v3 = vmul.f32 1.442695, %v219_v2  ;;  %p531_p8 = scmp.ne.s32.totalorder %s807_s30, %s530_s29  ;;  %s536_s3 = scalar_lea.vmem %s535_s26, 768 }
  0x5c   : > { %p537_p10 = scmp.lt.s32.totalorder %s807_s30, %s535_s26  ;;  %p538_p12 = scmp.lt.s32.totalorder %s536_s3, %s530_s29 }
  0x5d   : > { %464 = vpow2.f32 %v220_v3  ;;  %p532_p7 = pnand %p531_p8, %p876_p0 }
  0x5e   : > { %p539_p1 = por %p538_p12, %p537_p10 }
  0x5f   : > { %p533_p4 = pneg %p532_p7 }
  0x61   : > { %p540_p2 = pnand %p539_p1, %p533_p4 }
  0x67   : > { %v465_v4 = vpop.eup %464 }
  0x68   : > { %v222_v5 = vadd.f32 1.0, %v465_v4  ;;  %v236_v6 = vmul.f32 -0.5, %v465_v4  ;;  %v239_v11 = vand.u32 2147483647, %v465_v4 }
  0x6a   : > { %466 = vrcp.f32 %v222_v5  ;;  %v237_v8 = vadd.f32 1.0, %v236_v6  ;;  %vm240_vm0 = vcmp.lt.f32.partialorder %v239_v11, 0.0004427343 }
  0x6b   : > { %468 = vlog2.f32 %v222_v5 }
  0x6c   : > { %v238_v13 = vmul.f32 %v465_v4, %v237_v8 }
  0x74   : > { %v467_v12 = vpop.eup %466 }
  0x75   : > { %v469_v14 = vpop.eup %468  ;;  %v224_v15 = vmul.f32 %v467_v12, %v222_v5 }
  0x76   : > { %v235_v17 = vmul.f32 0.6931472, %v469_v14 }
  0x77   : > { %v225_v18 = vsub.f32 2.0, %v224_v15 }
  0x78   : > { %v241_v19 = vsel %vm240_vm0, %v238_v13, %v235_v17 }
  0x79   : > { %v226_v20 = vmul.f32 %v467_v12, %v225_v18  ;;  %v242_v21 = vadd.f32 %v241_v19, %v232_v16 }
  0x7b   : > { %v228_v22 = vmul.f32 %v465_v4, %v226_v20  ;;  %253 = vst [vmem:[%s215_s19 + $0x10] sm:$0xff] %v242_v21 }
  0x7d   : > { %v229_v23 = vsel %vm227_vm1, %v226_v20, %v228_v22 }
  0x7e   : > { %v243_v24 = vmul.f32 %v229_v23, %v217_v7  ;;  %v246_v25 = vadd.f32 %v229_v23, %v217_v7 }
  0x80   : > { %251 = vst [vmem:[%s215_s19] sm:$0xff] %v243_v24  ;;  %252 = vst [vmem:[%s215_s19 + $0x8] sm:$0xff] %v246_v25 }
  0x81   : > { %543 = shalt.err (!%p540_p2)
}
  0x82   : > { %s544_s8 = scalar_lea.hbm %s812_s28, 384  ;;  %s548_s6 = scalar_lea.hbm %s863_s2, 768 }
  0x83   : > { %p545_p9 = scmp.ne.s32.totalorder %s812_s28, %s544_s8  ;;  %p549_p6 = scmp.lt.u32.totalorder %s812_s28, %s863_s2 }
  0x84   : > { %p550_p13 = scmp.lt.u32.totalorder %s548_s6, %s544_s8  ;;  %p552_p8 = scmp.lt.u32.totalorder %s544_s8, %s812_s28 }
  0x85   : > { %p546_p11 = pnand %p545_p9, %p876_p0 }
  0x86   : > { %p551_p5 = por %p550_p13, %p549_p6 }
  0x87   : > { %p547_p3 = pneg %p546_p11 }
  0x88   : > { %p553_p7 = por %p552_p8, %p551_p5 }
  0x8a   : > { %p554_p4 = pnand %p553_p7, %p547_p3 }
  0x8c   : > { %557 = shalt.err (!%p554_p4)
}
  0x8d   : > { %s621_s21 = smov 128   ;;  %s622_s7 = smov 8  }
  0x8e   : > { %399 = dma.vmem_to_hbm [thread:$0]  (%p876_p0), %s807_s30, 384, %s812_s28, %s255_s12, %s621_s21, %s621_s21, %s622_s7  }
  0x8f PF: > { %s285_s19 = sand.u32 1, %s596_s9   ;;  %p877_p10 = scmp.ne.s32.totalorder %s869_s24, 0 }
  0x90   : > { %p878_p12 = scmp.ge.s32.totalorder %s616_s14, 2  ;;  %s286_s20 = scalar_lea.sflag [#allocation4], %s285_s19 }
  0x92   : > { %p409_p1 = pnand %p878_p12, %p877_p10 }
  0x94   : > { %591 = dma.done.wait (!%p409_p1), %s286_s20, 384  }
  0x95   : > { %593 = vsyncadd (!%p409_p1), %s286_s20, 4294966912  ;;  %s21_s14 = sadd.s32 1, %s616_s14   ;;  %s879_s9 = smov %s600_s10 }
  0x96   : > { %p18_p2 = scmp.ge.s32.totalorder %s21_s14, 4   ;;  %s880_s10 = smov %s604_s11 }
  0x97   : > { %s881_s11 = smov %s694_s23  ;;  %s882_s12 = smov %s612_s13 }
  0x98   : > { %s883_s13 = smov %s885_s17  ;;  %20 = sbr.rel (!%p18_p2) target bundleno = 8 (0x8), region = 86 }
  0x9f   :  { %291 = vsyncpa [#allocation3], 1 }
  0xa0   :  { %293 = vsyncpa [#allocation3 + $0x1], 1 }
  0xa1   :  { %294 = vsyncpa [#allocation6], 1 }
  0xa2   :  { %296 = vsyncpa [#allocation6 + $0x1], 1 }
  0xa3   :  { %297 = vsyncpa [#allocation4], 1 }
  0xa4   :  { %299 = vsyncpa [#allocation4 + $0x1], 1 }

</bundles_post_ra>
